<compile_context>
chip_gen: v7x
topology: tpu7x:2x2x1
jax: 0.10.0
libtpu: 0.0.40
codegen_flags: <defaults>
</compile_context>

<pallas_src>
import jax
import jax.numpy as jnp
from jax import lax
from jax.experimental import pallas as pl
from jax.experimental.pallas import tpu as pltpu


# ----------------------------- hyper-params ---------------------------------
CLASS_NUM = 19
WORD_VOCAB = 50
WORD_EMB_DIM = 32
POS_EMB_SIZE = 20
POS_EMB_DIM = 16
FEATURE_DIM = WORD_EMB_DIM + 2 * POS_EMB_DIM           # 64
VOCAB_TOTAL = WORD_VOCAB + 2 * POS_EMB_SIZE            # 90 packed-table rows
VOCAB_PAD = 128                                        # lane-padded vocab (1 vreg)
KERNEL_NUM = 32
KERNEL_SIZES = (3, 4, 5)
KMAX = max(KERNEL_SIZES)
SEQ_LEN_WORDS = 9                                      # words include dropped token
SEQ_LEN = SEQ_LEN_WORDS - 1                            # L = 8 after words[:, 1:, :]
SEQ_PAD = SEQ_LEN + KMAX - 1                           # 12 (padded taps match nothing)
BATCH = 2
OUT_PAD = 128                                          # lane-dense padded width


# ------------------------------- kernel --------------------------------------
def _net_kernel(idx_ref, wpack_ref, fpack_ref, out_ref):
    """Fused multi-hot -> folded conv taps -> mask/max/bias/ReLU -> split-FC.

    idx_ref   : (3, B, SEQ_PAD) int32  rows: words[:,1:], pos1+50, pos2+70;
                                       padded time steps hold -1 (match nothing)
    wpack_ref : (KMAX*128 + 128, 128) bf16
                rows [j*128:(j+1)*128] = folded conv weight of tap j (all branches)
                rows [KMAX*128:]       = combined split-FC weight
    fpack_ref : (SEQ_LEN + 2, 128) f32
                rows [0:SEQ_LEN] = additive -1e30 branch/time validity mask
                row  [SEQ_LEN]   = combined conv bias, row [SEQ_LEN+1] = fc bias
    out_ref   : (B, 128) f32  lane-dense padded logits
    """
    B = idx_ref.shape[1]
    L_pad = idx_ref.shape[2]
    L = L_pad - (KMAX - 1)

    # ---- multi-hot encoding of (word, pos1, pos2), built directly in bf16 ----
    iota = lax.broadcasted_iota(jnp.int32, (B, L_pad, VOCAB_PAD), 2)
    hit = ((iota == idx_ref[0][:, :, None])
           | (iota == idx_ref[1][:, :, None])
           | (iota == idx_ref[2][:, :, None]))
    mh = hit.astype(jnp.bfloat16)                      # exact 0/1 in bf16

    # ---- all conv branches fused & folded with the embedding: 5 tap matmuls --
    # (sublane-only time slicing; no lane-axis im2col concatenation)
    acc = None                                         # (B, L, 128) f32
    for j in range(KMAX):                              # static, unrolled
        wtap = wpack_ref[pl.ds(j * VOCAB_PAD, VOCAB_PAD), :]      # (128, 128) bf16
        part = lax.dot_general(                        # (B, L, 128) f32 accum
            mh[:, j:j + L, :], wtap,
            dimension_numbers=(((2,), (0,)), ((), ())),
            preferred_element_type=jnp.float32)
        acc = part if acc is None else acc + part

    # ---- mask invalid windows, max over time, bias + ReLU (f32 VPU) ----------
    neg_mask = fpack_ref[pl.ds(0, L), :]               # (L, 128): 0 or -1e30
    pooled = jnp.max(acc + neg_mask[None, :, :], axis=1)          # (B, 128)
    pooled = jnp.maximum(pooled + fpack_ref[pl.ds(L, 1), :], 0.0)

    # ---- single split-FC matmul (bf16 operands, f32 accumulation) ------------
    fcw = wpack_ref[pl.ds(KMAX * VOCAB_PAD, OUT_PAD), :]          # (128, 128) bf16
    logits = jnp.dot(pooled.astype(jnp.bfloat16), fcw,
                     preferred_element_type=jnp.float32)
    # (dropout == identity in eval mode)
    out_ref[...] = logits + fpack_ref[pl.ds(L + 1, 1), :]         # lane-dense store


# ------------------------------ wrapper ---------------------------------------
def _cost_estimate(B):
    L = SEQ_LEN
    flops = 2 * B * L * VOCAB_PAD * OUT_PAD * KMAX     # folded conv tap matmuls
    flops += 2 * B * OUT_PAD * OUT_PAD                 # split-FC matmul
    bytes_accessed = (3 * B * SEQ_PAD * 4                              # idx
                      + (KMAX * VOCAB_PAD + OUT_PAD) * OUT_PAD * 2     # bf16 weights
                      + (L + 2) * OUT_PAD * 4                          # f32 mask+bias
                      + B * OUT_PAD * 4)                               # output
    return pl.CostEstimate(flops=flops, transcendentals=0,
                           bytes_accessed=bytes_accessed)


def net_forward_pallas(idx_pad, wpack, fpack):
    """idx_pad: (3, B, SEQ_PAD) int32. Returns padded logits (B, 128) f32."""
    B = idx_pad.shape[1]
    return pl.pallas_call(
        _net_kernel,
        out_shape=jax.ShapeDtypeStruct((B, OUT_PAD), jnp.float32),
        # Whole (tiny) problem fits in VMEM: every operand is one full block.
        in_specs=[pl.BlockSpec(memory_space=pltpu.MemorySpace.VMEM)] * 3,
        out_specs=pl.BlockSpec(memory_space=pltpu.MemorySpace.VMEM),
        cost_estimate=_cost_estimate(B),
    )(idx_pad, wpack, fpack)


def net_forward(packed, words, pos1, pos2):
    # Only integer index plumbing stays outside the kernel.
    words_s = words[:, 1:]                                        # drop first token
    idx = jnp.stack(
        [words_s, pos1 + WORD_VOCAB, pos2 + WORD_VOCAB + POS_EMB_SIZE],
        axis=0).astype(jnp.int32)                                 # (3, B, L)
    idx_pad = jnp.pad(idx, ((0, 0), (0, 0), (0, KMAX - 1)),
                      constant_values=-1)                         # -1 matches nothing
    logits_pad = net_forward_pallas(idx_pad, packed["wpack"], packed["fpack"])
    return logits_pad[:, :CLASS_NUM]                              # (B, 19)


# ------------------------------ glue / params --------------------------------
def init_params(key):
    ks = jax.random.split(key, 4 + 2 * len(KERNEL_SIZES))
    word_emb = jax.random.normal(ks[0], (WORD_VOCAB, WORD_EMB_DIM), jnp.float32) * 0.1
    pos1_emb = jax.random.normal(ks[1], (POS_EMB_SIZE, POS_EMB_DIM), jnp.float32) * 0.1
    pos2_emb = jax.random.normal(ks[2], (POS_EMB_SIZE, POS_EMB_DIM), jnp.float32) * 0.1
    # padding_idx=0 -> zero row
    pos1_emb = pos1_emb.at[0].set(0.0)
    pos2_emb = pos2_emb.at[0].set(0.0)

    conv_ws, conv_bs = [], []
    for i, k in enumerate(KERNEL_SIZES):
        # stored as (k, C, Kn) == transpose of PyTorch's (Kn, C, k)
        w = jax.random.normal(ks[3 + 2 * i], (k, FEATURE_DIM, KERNEL_NUM), jnp.float32) * 0.05
        b = jax.random.normal(ks[4 + 2 * i], (KERNEL_NUM,), jnp.float32) * 0.05
        conv_ws.append(w)
        conv_bs.append(b)

    fc_in = KERNEL_NUM * len(KERNEL_SIZES)
    fc_w = jax.random.normal(ks[-1], (fc_in, CLASS_NUM), jnp.float32) * 0.05
    fc_b = jnp.zeros((CLASS_NUM,), jnp.float32)
    return dict(word_emb=word_emb, pos1_emb=pos1_emb, pos2_emb=pos2_emb,
                conv_ws=conv_ws, conv_bs=conv_bs, fc_w=fc_w, fc_b=fc_b)


def pack_params(p):
    """One-time repack of the PyTorch-style params into TWO kernel operands."""
    # Packed channel table: rows [word | pos1+50 | pos2+70], channel slices
    # [0:32 | 32:48 | 48:64], so multi-hot @ table == cat of the three lookups.
    table = jnp.zeros((VOCAB_TOTAL, FEATURE_DIM), jnp.float32)
    table = table.at[:WORD_VOCAB, :WORD_EMB_DIM].set(p["word_emb"])
    table = table.at[WORD_VOCAB:WORD_VOCAB + POS_EMB_SIZE,
                     WORD_EMB_DIM:WORD_EMB_DIM + POS_EMB_DIM].set(p["pos1_emb"])
    table = table.at[WORD_VOCAB + POS_EMB_SIZE:,
                     WORD_EMB_DIM + POS_EMB_DIM:].set(p["pos2_emb"])

    # Fold the embedding into every conv tap and fuse the three branches into
    # 96 of 128 output lanes: Wfold[j][:, bi*32:(bi+1)*32] = table @ Wk[j].
    wfold = jnp.zeros((KMAX, VOCAB_PAD, OUT_PAD), jnp.float32)
    for bi, (k, w) in enumerate(zip(KERNEL_SIZES, p["conv_ws"])):
        c0 = bi * KERNEL_NUM
        for j in range(k):
            wfold = wfold.at[j, :VOCAB_TOTAL, c0:c0 + KERNEL_NUM].set(table @ w[j])

    # Combined split-FC weight, zero-padded to a lane-dense 128x128 block.
    fcw = jnp.zeros((OUT_PAD, OUT_PAD), jnp.float32)
    fcw = fcw.at[:KERNEL_NUM * len(KERNEL_SIZES), :CLASS_NUM].set(p["fc_w"])

    wpack = jnp.concatenate([wfold.reshape(KMAX * VOCAB_PAD, OUT_PAD), fcw],
                            axis=0).astype(jnp.bfloat16)          # (768, 128) bf16

    # f32 pack: additive validity mask (-1e30 where a branch's conv window runs
    # past the sequence) + combined conv bias + fc bias.
    neg_mask = jnp.zeros((SEQ_LEN, OUT_PAD), jnp.float32)
    conv_b = jnp.zeros((1, OUT_PAD), jnp.float32)
    for bi, (k, b) in enumerate(zip(KERNEL_SIZES, p["conv_bs"])):
        c0 = bi * KERNEL_NUM
        l_out = SEQ_LEN - k + 1
        neg_mask = neg_mask.at[l_out:, c0:c0 + KERNEL_NUM].set(-1e30)
        conv_b = conv_b.at[0, c0:c0 + KERNEL_NUM].set(b)
    fc_b = jnp.zeros((1, OUT_PAD), jnp.float32).at[0, :CLASS_NUM].set(p["fc_b"])
    fpack = jnp.concatenate([neg_mask, conv_b, fc_b], axis=0)     # (L+2, 128) f32

    return dict(wpack=wpack, fpack=fpack)


def net_forward_ref(p, words, pos1, pos2):
    """Pure-JAX f32 reference mirroring the PyTorch forward (eval mode)."""
    w = p["word_emb"][words][:, 1:, :]
    e1 = p["pos1_emb"][pos1]
    e2 = p["pos2_emb"][pos2]
    feat = jnp.concatenate([w, e1, e2], axis=2)                   # (B, L, 64)
    pooled = []
    for k, cw, cb in zip(KERNEL_SIZES, p["conv_ws"], p["conv_bs"]):
        l_out = feat.shape[1] - k + 1
        conv = sum(jnp.einsum("blc,cn->bln", feat[:, j:j + l_out, :], cw[j])
                   for j in range(k)) + cb[None, None, :]
        pooled.append(jnp.max(jax.nn.relu(conv), axis=1))
    x = jnp.concatenate(pooled, axis=1)                           # (B, 96)
    return x @ p["fc_w"] + p["fc_b"][None, :]


# --------------------------------- main ---------------------------------------
if __name__ == "__main__":
    key = jax.random.PRNGKey(0)
    pkey, k_w, k_p1, k_p2 = jax.random.split(key, 4)

    params = init_params(pkey)
    packed = pack_params(params)
    words = jax.random.randint(k_w, (BATCH, SEQ_LEN_WORDS), 0, WORD_VOCAB, jnp.int32)
    pos1 = jax.random.randint(k_p1, (BATCH, SEQ_LEN), 0, POS_EMB_SIZE, jnp.int32)
    pos2 = jax.random.randint(k_p2, (BATCH, SEQ_LEN), 0, POS_EMB_SIZE, jnp.int32)

    fwd = jax.jit(net_forward)
    logits = fwd(packed, words, pos1, pos2)
    jax.block_until_ready(logits)
    assert logits.shape == (BATCH, CLASS_NUM) and logits.dtype == jnp.float32

    # Tolerance check vs. pure-JAX f32 reference (bf16 MXU operands in kernel).
    ref = net_forward_ref(params, words, pos1, pos2)
    err = float(jnp.max(jnp.abs(logits - ref)))
    assert err < 5e-2, f"max abs error vs reference: {err}"
    print("KERNEL_OK")
</pallas_src>

<mosaic_0001>
module attributes {stable_mosaic.version = 11 : i64} {
  func.func @_net_kernel(%arg0: memref<3x2x12xi32, #tpu.memory_space<vmem>>, %arg1: memref<768x128xbf16, #tpu.memory_space<vmem>>, %arg2: memref<10x128xf32, #tpu.memory_space<vmem>>, %arg3: memref<2x128xf32, #tpu.memory_space<vmem>>) attributes {dimension_semantics = [], scalar_prefetch = 0 : i64, scratch_operands = 0 : i64, tpu.core_type = #tpu.core_type<tc>} {
    %0 = tpu.iota {dimensions = array<i32: 2>} : vector<2x12x128xi32>
    %c0 = arith.constant 0 : index
    %c0_0 = arith.constant 0 : index
    %c0_1 = arith.constant 0 : index
    %1 = vector.load %arg0[%c0, %c0_0, %c0_1] : memref<3x2x12xi32, #tpu.memory_space<vmem>>, vector<1x2x12xi32>
    %2 = vector.shape_cast %1 : vector<1x2x12xi32> to vector<2x12xi32>
    %3 = vector.shape_cast %2 : vector<2x12xi32> to vector<2x12x1xi32>
    %4 = vector.broadcast %3 : vector<2x12x1xi32> to vector<2x12x128xi32>
    %5 = arith.cmpi eq, %0, %4 : vector<2x12x128xi32>
    %c1 = arith.constant 1 : index
    %c0_2 = arith.constant 0 : index
    %c0_3 = arith.constant 0 : index
    %6 = vector.load %arg0[%c1, %c0_2, %c0_3] : memref<3x2x12xi32, #tpu.memory_space<vmem>>, vector<1x2x12xi32>
    %7 = vector.shape_cast %6 : vector<1x2x12xi32> to vector<2x12xi32>
    %8 = vector.shape_cast %7 : vector<2x12xi32> to vector<2x12x1xi32>
    %9 = vector.broadcast %8 : vector<2x12x1xi32> to vector<2x12x128xi32>
    %10 = arith.cmpi eq, %0, %9 : vector<2x12x128xi32>
    %11 = arith.ori %5, %10 : vector<2x12x128xi1>
    %c2 = arith.constant 2 : index
    %c0_4 = arith.constant 0 : index
    %c0_5 = arith.constant 0 : index
    %12 = vector.load %arg0[%c2, %c0_4, %c0_5] : memref<3x2x12xi32, #tpu.memory_space<vmem>>, vector<1x2x12xi32>
    %13 = vector.shape_cast %12 : vector<1x2x12xi32> to vector<2x12xi32>
    %14 = vector.shape_cast %13 : vector<2x12xi32> to vector<2x12x1xi32>
    %15 = vector.broadcast %14 : vector<2x12x1xi32> to vector<2x12x128xi32>
    %16 = arith.cmpi eq, %0, %15 : vector<2x12x128xi32>
    %17 = arith.ori %11, %16 : vector<2x12x128xi1>
    %18 = arith.extui %17 : vector<2x12x128xi1> to vector<2x12x128xi32>
    %19 = arith.sitofp %18 : vector<2x12x128xi32> to vector<2x12x128xf32>
    %20 = arith.truncf %19 : vector<2x12x128xf32> to vector<2x12x128xbf16>
    %c0_6 = arith.constant 0 : index
    %c0_7 = arith.constant 0 : index
    %21 = vector.load %arg1[%c0_6, %c0_7] : memref<768x128xbf16, #tpu.memory_space<vmem>>, vector<128x128xbf16>
    %22 = vector.extract_strided_slice %20 {offsets = [0, 0, 0], sizes = [2, 8, 128], strides = [1, 1, 1]} : vector<2x12x128xbf16> to vector<2x8x128xbf16>
    %cst = arith.constant dense<0.000000e+00> : vector<2x8x128xf32>
    %23 = tpu.matmul %22, %21, %cst {dimension_numbers = #tpu.dot_dimension_numbers<[2], [0], [0, 1], [1], [0, 0, 0, 1, 1, 1], [], []>} : vector<2x8x128xbf16>, vector<128x128xbf16>, vector<2x8x128xf32> -> vector<2x8x128xf32>
    %c128 = arith.constant 128 : index
    %c0_8 = arith.constant 0 : index
    %24 = vector.load %arg1[%c128, %c0_8] : memref<768x128xbf16, #tpu.memory_space<vmem>>, vector<128x128xbf16>
    %25 = vector.extract_strided_slice %20 {offsets = [0, 1, 0], sizes = [2, 8, 128], strides = [1, 1, 1]} : vector<2x12x128xbf16> to vector<2x8x128xbf16>
    %cst_9 = arith.constant dense<0.000000e+00> : vector<2x8x128xf32>
    %26 = tpu.matmul %25, %24, %cst_9 {dimension_numbers = #tpu.dot_dimension_numbers<[2], [0], [0, 1], [1], [0, 0, 0, 1, 1, 1], [], []>} : vector<2x8x128xbf16>, vector<128x128xbf16>, vector<2x8x128xf32> -> vector<2x8x128xf32>
    %27 = arith.addf %23, %26 : vector<2x8x128xf32>
    %c256 = arith.constant 256 : index
    %c0_10 = arith.constant 0 : index
    %28 = vector.load %arg1[%c256, %c0_10] : memref<768x128xbf16, #tpu.memory_space<vmem>>, vector<128x128xbf16>
    %29 = vector.extract_strided_slice %20 {offsets = [0, 2, 0], sizes = [2, 8, 128], strides = [1, 1, 1]} : vector<2x12x128xbf16> to vector<2x8x128xbf16>
    %cst_11 = arith.constant dense<0.000000e+00> : vector<2x8x128xf32>
    %30 = tpu.matmul %29, %28, %cst_11 {dimension_numbers = #tpu.dot_dimension_numbers<[2], [0], [0, 1], [1], [0, 0, 0, 1, 1, 1], [], []>} : vector<2x8x128xbf16>, vector<128x128xbf16>, vector<2x8x128xf32> -> vector<2x8x128xf32>
    %31 = arith.addf %27, %30 : vector<2x8x128xf32>
    %c384 = arith.constant 384 : index
    %c0_12 = arith.constant 0 : index
    %32 = vector.load %arg1[%c384, %c0_12] : memref<768x128xbf16, #tpu.memory_space<vmem>>, vector<128x128xbf16>
    %33 = vector.extract_strided_slice %20 {offsets = [0, 3, 0], sizes = [2, 8, 128], strides = [1, 1, 1]} : vector<2x12x128xbf16> to vector<2x8x128xbf16>
    %cst_13 = arith.constant dense<0.000000e+00> : vector<2x8x128xf32>
    %34 = tpu.matmul %33, %32, %cst_13 {dimension_numbers = #tpu.dot_dimension_numbers<[2], [0], [0, 1], [1], [0, 0, 0, 1, 1, 1], [], []>} : vector<2x8x128xbf16>, vector<128x128xbf16>, vector<2x8x128xf32> -> vector<2x8x128xf32>
    %35 = arith.addf %31, %34 : vector<2x8x128xf32>
    %c512 = arith.constant 512 : index
    %c0_14 = arith.constant 0 : index
    %36 = vector.load %arg1[%c512, %c0_14] : memref<768x128xbf16, #tpu.memory_space<vmem>>, vector<128x128xbf16>
    %37 = vector.extract_strided_slice %20 {offsets = [0, 4, 0], sizes = [2, 8, 128], strides = [1, 1, 1]} : vector<2x12x128xbf16> to vector<2x8x128xbf16>
    %cst_15 = arith.constant dense<0.000000e+00> : vector<2x8x128xf32>
    %38 = tpu.matmul %37, %36, %cst_15 {dimension_numbers = #tpu.dot_dimension_numbers<[2], [0], [0, 1], [1], [0, 0, 0, 1, 1, 1], [], []>} : vector<2x8x128xbf16>, vector<128x128xbf16>, vector<2x8x128xf32> -> vector<2x8x128xf32>
    %39 = arith.addf %35, %38 : vector<2x8x128xf32>
    %c0_16 = arith.constant 0 : index
    %c0_17 = arith.constant 0 : index
    %40 = vector.load %arg2[%c0_16, %c0_17] : memref<10x128xf32, #tpu.memory_space<vmem>>, vector<8x128xf32>
    %41 = vector.shape_cast %40 : vector<8x128xf32> to vector<1x8x128xf32>
    %42 = vector.broadcast %41 : vector<1x8x128xf32> to vector<2x8x128xf32>
    %43 = arith.addf %39, %42 : vector<2x8x128xf32>
    %cst_18 = arith.constant dense<0xFF800000> : vector<2x128xf32>
    %44 = vector.multi_reduction <maximumf>, %43, %cst_18 [1] : vector<2x8x128xf32> to vector<2x128xf32>
    %c8 = arith.constant 8 : index
    %c0_19 = arith.constant 0 : index
    %45 = vector.load %arg2[%c8, %c0_19] : memref<10x128xf32, #tpu.memory_space<vmem>>, vector<1x128xf32>
    %46 = vector.broadcast %45 : vector<1x128xf32> to vector<2x128xf32>
    %47 = arith.addf %44, %46 : vector<2x128xf32>
    %cst_20 = arith.constant 0.000000e+00 : f32
    %48 = vector.broadcast %cst_20 : f32 to vector<2x128xf32>
    %49 = arith.maximumf %47, %48 : vector<2x128xf32>
    %c640 = arith.constant 640 : index
    %c0_21 = arith.constant 0 : index
    %50 = vector.load %arg1[%c640, %c0_21] : memref<768x128xbf16, #tpu.memory_space<vmem>>, vector<128x128xbf16>
    %51 = arith.truncf %49 : vector<2x128xf32> to vector<2x128xbf16>
    %cst_22 = arith.constant dense<0.000000e+00> : vector<2x128xf32>
    %52 = tpu.matmul %51, %50, %cst_22 {dimension_numbers = #tpu.dot_dimension_numbers<[1], [0], [0], [1], [0, 0, 1, 1], [], []>} : vector<2x128xbf16>, vector<128x128xbf16>, vector<2x128xf32> -> vector<2x128xf32>
    %c9 = arith.constant 9 : index
    %c0_23 = arith.constant 0 : index
    %53 = vector.load %arg2[%c9, %c0_23] : memref<10x128xf32, #tpu.memory_space<vmem>>, vector<1x128xf32>
    %54 = vector.broadcast %53 : vector<1x128xf32> to vector<2x128xf32>
    %55 = arith.addf %52, %54 : vector<2x128xf32>
    %c0_24 = arith.constant 0 : index
    %c0_25 = arith.constant 0 : index
    %56 = vector.load %arg3[%c0_24, %c0_25] : memref<2x128xf32, #tpu.memory_space<vmem>>, vector<2x128xf32>
    tpu.vector_store %arg3[%c0_24, %c0_25], %55 {strides = array<i32>} : memref<2x128xf32, #tpu.memory_space<vmem>>, vector<2x128xf32>,
    return
  }
}

</mosaic_0001>

<bundles_post_ra>
// kernel: net_forward.1
= control target key start
LH: loop header
LB: loop body
LE: loop exit
PB: predicated region body
PF: predicated region fallthrough
CT: control target
= control target key end

     0   :  { %8 = vsyncpa [#allocation3], 0  ;;  %s1466_s0 = inlined_call_operand.vmem [shape: s32[3,2,12], index: 0, kind: input, shape index: {}]   ;;  %s1467_s1 = inlined_call_operand.hbm [shape: bf16[768,128], index: 1, kind: input, shape index: {}]   ;;  %s1468_s2 = inlined_call_operand.vmem [shape: f32[10,128], index: 2, kind: input, shape index: {}]   ;;  %s1469_s3 = inlined_call_operand.hbm [shape: f32[2,128], index: 3, kind: output, shape index: {}]  }
   0x1   :  { %9 = vsyncpa [#allocation4], 0  ;;  %s1281_s12 = smov [#allocation2]   ;;  %s1233_s16 = scalar_lea.hbm %s1467_s1, 6144 }
   0x2   :  { %s17_s13 = sshll.u32 %s1281_s12, 4  ;;  %p1234_p0 = scmp.ne.s32.totalorder %s1467_s1, %s1233_s16  ;;  %s18_s13 = int_to_ptr.vmem [resolvable:$true] %s17_s13 }
   0x3   :  { %p1237_p1 = scmp.lt.u32.totalorder %s1233_s16, %s1467_s1 }
   0x5   :  { %p1239_p2 = pnand %p1237_p1, %p1234_p0 }
   0x7   :  { %1242 = shalt.err (!%p1239_p2)
}
   0x8   :  { %s1243_s21 = scalar_lea.vmem %s18_s13, 6144  ;;  %p1248_p4 = scmp.lt.s32.totalorder %s18_s13, %s18_s13 }
   0x9   :  { %p1244_p3 = scmp.ne.s32.totalorder %s18_s13, %s1243_s21  ;;  %p1249_p5 = scmp.lt.s32.totalorder %s1243_s21, %s1243_s21 }
   0xb   :  { %p1250_p6 = por %p1249_p5, %p1248_p4 }
   0xd   :  { %p1251_p7 = pnand %p1250_p6, %p1244_p3 }
   0xf   :  { %1254 = shalt.err (!%p1251_p7)
}
  0x10   :  { %s1282_s22 = smov 64   ;;  %s1283_s23 = smov 4  }
  0x11   :  { %23 = dma.hbm_to_vmem [thread:$0]  %s1467_s1, 6144, %s18_s13, [#allocation3], %s1282_s22, %s1282_s22, %s1283_s23  }
  0x12   :  { %1277 = dma.done.wait [#allocation3], 6144  }
  0x13   :  { %1278 = vsyncadd [#allocation3], 4294961152  ;;  %v30_v0 = vlaneseq  ;;  %v1284_v1 = vmov 0.0   ;;  %v928_v5 = vld [vmem:[%s1466_s0 + $0x2] sm:$0x3]  ;;  %v1186_v13 = vld [vmem:[#allocation2 + $0x8] sm:$0xff]  }
  0x14   :  { %1078 = vmatprep.subr.bf16.mxu1 %v1284_v1  ;;  %1058 = vmatprep.subr.bf16.mxu0 %v1284_v1  ;;  %v32_v6 = vld [vmem:[%s1466_s0] sm:$0x3]  ;;  %v929_v10 = vld [vmem:[%s1466_s0 + $0x4] sm:$0x3]  ;;  %vm1285_vm0 = vmmov 0   ;;  %v1187_v16 = vld [vmem:[#allocation2 + $0x10] sm:$0xff]  }
  0x15   :  { %v34_v2 = vshrl.u32 %v30_v0, 7  ;;  %v1185_v9 = vld [vmem:[#allocation2] sm:$0xff]   ;;  %1094 = vmatprep.mubr.msk.bf16.mxu1 %vm1285_vm0, %v1284_v1  ;;  %1074 = vmatprep.mubr.msk.bf16.mxu0 %vm1285_vm0, %v1284_v1  ;;  %v1193_v18 = vld [vmem:[#allocation2 + $0x48] sm:$0xff]   ;;  %v1188_v19 = vld [vmem:[#allocation2 + $0x18] sm:$0xff]   ;;  %v31_v32 = vand.u32 127, %v30_v0  ;;  %s1287_s9 = smov [#allocation5]  }
  0x16   :  { %1079 = vmatpush3.bf16.msra.mxu1 %v1185_v9  ;;  %v1191_v17 = vld [vmem:[#allocation2 + $0x40] sm:$0xff]   ;;  %v1195_v20 = vld [vmem:[#allocation2 + $0x50] sm:$0xff]   ;;  %v1197_v22 = vld [vmem:[#allocation2 + $0x58] sm:$0xff]   ;;  %v1286_v44 = vmov 1.0|1.0   ;;  %s919_s10 = sshll.u32 %s1287_s9, 4  ;;  %s920_s10 = int_to_ptr.vmem [resolvable:$true] %s919_s10 }
  0x17   :  { %v35_v3 = vsub.s32 0, %v34_v2  ;;  %v46_v4 = vsub.s32 1, %v34_v2  ;;  %1080 = vmatprep.subr.bf16.mxu1 %v1284_v1  ;;  %1059 = vmatpush3.bf16.msra.mxu0 %v1191_v17  ;;  %v1189_v21 = vld [vmem:[#allocation2 + $0x20] sm:$0xff]   ;;  %v1190_v23 = vld [vmem:[#allocation2 + $0x28] sm:$0xff]   ;;  %v1192_v25 = vld [vmem:[#allocation2 + $0x30] sm:$0xff]   ;;  %s1255_s11 = scalar_lea.vmem %s920_s10, 32  ;;  %p1260_p9 = scmp.lt.s32.totalorder %s920_s10, %s920_s10 }
  0x18   :  { %1060 = vmatprep.subr.bf16.mxu0 %v1284_v1  ;;  %v1199_v24 = vld [vmem:[#allocation2 + $0x60] sm:$0xff]   ;;  %v1201_v26 = vld [vmem:[#allocation2 + $0x68] sm:$0xff]   ;;  %v1194_v27 = vld [vmem:[#allocation2 + $0x38] sm:$0xff]   ;;  %p1256_p8 = scmp.ne.s32.totalorder %s920_s10, %s1255_s11  ;;  %p1261_p10 = scmp.lt.s32.totalorder %s1255_s11, %s1255_s11 }
  0x19   :  { %v64_v7 = vrot.slane %v928_v5, %v35_v3  ;;  %v36_v8 = vrot.slane %v32_v6, %v35_v3  ;;  %v75_v11 = vrot.slane %v928_v5, %v46_v4  ;;  %v47_v12 = vrot.slane %v32_v6, %v46_v4  ;;  %v1203_v28 = vld [vmem:[#allocation2 + $0x70] sm:$0xff]   ;;  %v1205_v29 = vld [vmem:[#allocation2 + $0x78] sm:$0xff]   ;;  %v1196_v37 = vld [vmem:[#allocation2 + $0xc0] sm:$0xff]  }
  0x1a   :  { %v107_v14 = vrot.slane %v929_v10, %v46_v4  ;;  %v96_v15 = vrot.slane %v929_v10, %v35_v3  ;;  %1081 = vmatpush3.bf16.msra.mxu1 %v1186_v13  ;;  %v1198_v45 = vld [vmem:[#allocation2 + $0xc8] sm:$0xff]   ;;  %v1200_v52 = vld [vmem:[#allocation2 + $0xd0] sm:$0xff]   ;;  %v1202_v59 = vld [vmem:[#allocation2 + $0xd8] sm:$0xff]   ;;  %p1262_p11 = por %p1261_p10, %p1260_p9 }
  0x1b   :  { %66 = vbcast.lane.b32.xlu1 %v64_v7, 256  ;;  %38 = vbcast.lane.b32.xlu0 %v36_v8, 256  ;;  %v1204_v5 = vld [vmem:[#allocation2 + $0xe0] sm:$0xff]   ;;  %v1227_v6 = vld [vmem:[#allocation2 + $0x150] sm:$0xff]  }
  0x1c   :  { %1082 = vmatprep.subr.bf16.mxu1 %v1284_v1  ;;  %1061 = vmatpush3.bf16.msra.mxu0 %v1193_v18  ;;  %p1263_p12 = pnand %p1262_p11, %p1256_p8 }
  0x1d   :  { %1062 = vmatprep.subr.bf16.mxu0 %v1284_v1 }
  0x1e   :  { %1083 = vmatpush3.bf16.msra.mxu1 %v1187_v16 }
  0x1f   :  { %77 = vbcast.lane.b32.xlu1 %v75_v11, 256  ;;  %49 = vbcast.lane.b32.xlu0 %v47_v12, 256 }
  0x20   :  { %1084 = vmatprep.subr.bf16.mxu1 %v1284_v1  ;;  %1063 = vmatpush3.bf16.msra.mxu0 %v1195_v20 }
  0x21   :  { %1064 = vmatprep.subr.bf16.mxu0 %v1284_v1 }
  0x22   :  { %1085 = vmatpush3.bf16.msra.mxu1 %v1188_v19 }
  0x23   :  { %109 = vbcast.lane.b32.xlu1 %v107_v14, 256  ;;  %98 = vbcast.lane.b32.xlu0 %v96_v15, 256 }
  0x24   :  { %1086 = vmatprep.subr.bf16.mxu1 %v1284_v1  ;;  %1065 = vmatpush3.bf16.msra.mxu0 %v1197_v22  ;;  %v1206_v22 = vld [vmem:[#allocation2 + $0xe8] sm:$0xff]  }
  0x25   :  { %1066 = vmatprep.subr.bf16.mxu0 %v1284_v1 }
  0x26   :  { %1087 = vmatpush3.bf16.msra.mxu1 %v1189_v21 }
  0x27   :  { %53 = vbcast.lane.b32.xlu1 %v47_v12, 264  ;;  %42 = vbcast.lane.b32.xlu0 %v36_v8, 264 }
  0x28   :  { %1088 = vmatprep.subr.bf16.mxu1 %v1284_v1  ;;  %1067 = vmatpush3.bf16.msra.mxu0 %v1199_v24 }
  0x29   :  { %1068 = vmatprep.subr.bf16.mxu0 %v1284_v1 }
  0x2a   :  { %1089 = vmatpush3.bf16.msra.mxu1 %v1190_v23 }
  0x2b   :  { %81 = vbcast.lane.b32.xlu1 %v75_v11, 264  ;;  %70 = vbcast.lane.b32.xlu0 %v64_v7, 264  ;;  %v1232_v11 = vld [vmem:[#allocation2 + $0x178] sm:$0xff]  }
  0x2c   :  { %1090 = vmatprep.subr.bf16.mxu1 %v1284_v1  ;;  %1069 = vmatpush3.bf16.msra.mxu0 %v1201_v26 }
  0x2d   :  { %1070 = vmatprep.subr.bf16.mxu0 %v1284_v1 }
  0x2e   :  { %1091 = vmatpush3.bf16.msra.mxu1 %v1192_v25 }
  0x2f   :  { %113 = vbcast.lane.b32.xlu1 %v107_v14, 264  ;;  %102 = vbcast.lane.b32.xlu0 %v96_v15, 264 }
  0x30   :  { %1092 = vmatprep.subr.bf16.mxu1 %v1284_v1  ;;  %1071 = vmatpush3.bf16.msra.mxu0 %v1203_v28  ;;  %v1207_v28 = vld [vmem:[#allocation2 + $0x80] sm:$0xff]  }
  0x31   :  { %1072 = vmatprep.subr.bf16.mxu0 %v1284_v1 }
  0x32   :  { %1093 = vmatpush3.bf16.msra.mxu1 %v1194_v27 }
  0x33   :  { %1118 = vmatprep.subr.bf16.mxu1 %v1284_v1 }
  0x34   :  { %1073 = vmatpush3.bf16.msra.mxu0 %v1205_v29 }
  0x35   :  { %1098 = vmatprep.subr.bf16.mxu0 %v1284_v1 }
  0x8d   :  { %v67_v30 = vpop.permute.xlu1 %66  ;;  %v39_v31 = vpop.permute.xlu0 %38 }
  0x8e   :  { %vm83_vm1 = vcmp.eq.s32.totalorder %v31_v32, %v67_v30  ;;  %vm55_vm2 = vcmp.eq.s32.totalorder %v31_v32, %v39_v31 }
  0x8f   :  { %vm87_vm5 = vmor %vm55_vm2, %vm83_vm1 }
  0x91   :  { %v78_v33 = vpop.permute.xlu1 %77  ;;  %v50_v34 = vpop.permute.xlu0 %49 }
  0x92   :  { %vm85_vm3 = vcmp.eq.s32.totalorder %v31_v32, %v78_v33  ;;  %vm57_vm4 = vcmp.eq.s32.totalorder %v31_v32, %v50_v34  ;;  %v1208_v34 = vld [vmem:[#allocation2 + $0xf0] sm:$0xff]  }
  0x93   :  { %vm89_vm6 = vmor %vm57_vm4, %vm85_vm3 }
  0x95   :  { %v110_v35 = vpop.permute.xlu1 %109  ;;  %v99_v36 = vpop.permute.xlu0 %98 }
  0x96   :  { %vm117_vm7 = vcmp.eq.s32.totalorder %v31_v32, %v110_v35  ;;  %vm115_vm8 = vcmp.eq.s32.totalorder %v31_v32, %v99_v36 }
  0x97   :  { %vm121_vm9 = vmor %vm89_vm6, %vm117_vm7  ;;  %vm175_vm7 = vsmask.f32 3328 }
  0x98   :  { %v932_v38 = vsel %vm121_vm9, 1.0, %v1284_v1  ;;  %vm119_vm10 = vmor %vm87_vm5, %vm115_vm8  ;;  %vm176_vm8 = vsmask.f32 7440 }
  0x99   :  { %v1354_v39 = vpack.c.bf16 %v932_v38, %v932_v38  ;;  %v930_v40 = vsel %vm119_vm10, 1.0, %v1284_v1  ;;  %vm1002_vm11 = vmpackc.low %vm121_vm9, %vm119_vm10  ;;  %v54_v41 = vpop.permute.xlu1 %53  ;;  %v43_v42 = vpop.permute.xlu0 %42  ;;  %vm662_vm9 = vcmask 1041408   ;;  %vm663_vm10 = vcmask 1045508  }
  0x9a   :  { %v1357_v43 = vpack.c.bf16 %v930_v40, %v930_v40  ;;  %1095 = vmatmul.mubr.msk.bf16.vlgmr.msra.gmra.mrb[0].mxu1 %vm1002_vm11, %v1286_v44  ;;  %vm58_vm14 = vcmp.eq.s32.totalorder %v31_v32, %v54_v41  ;;  %vm56_vm15 = vcmp.eq.s32.totalorder %v31_v32, %v43_v42  ;;  %vm1376_vm11 = vmor %vm175_vm7, %vm176_vm8  ;;  %v1210_v41 = vld [vmem:[#allocation2 + $0xf8] sm:$0xff]  }
  0x9b   :  { %1119 = vmatpush3.bf16.msra.mxu1 %v1196_v37  ;;  %1134 = vmatprep.mubr.msk.bf16.mxu1 %vm1285_vm0, %v1284_v1  ;;  %v193_v46 = vshrl.u32 %v1354_v39, 16  ;;  %v196_v47 = vshll.u32 %v1354_v39, 16  ;;  %v977_v3 = vrot.slane %v1354_v39, 10  ;;  %v1209_v37 = vld [vmem:[#allocation2 + $0x88] sm:$0xff]  }
  0x9c   :  { %1120 = vmatprep.subr.bf16.mxu1 %v1284_v1  ;;  %v179_v50 = vshrl.u32 %v1357_v43, 16  ;;  %v182_v51 = vshll.u32 %v1357_v43, 16  ;;  %v976_v12 = vrot.slane %v1357_v43, 10 }
  0x9d   :  { %v82_v48 = vpop.permute.xlu1 %81  ;;  %v71_v49 = vpop.permute.xlu0 %70  ;;  %v195_v55 = vrot.slane %v193_v46, 4  ;;  %v198_v56 = vrot.slane %v196_v47, 5  ;;  %v541_v16 = vrot.slane %v193_v46, 5  ;;  %v542_v17 = vrot.slane %v196_v47, 6 }
  0x9e   :  { %vm86_vm12 = vcmp.eq.s32.totalorder %v31_v32, %v82_v48  ;;  %vm84_vm13 = vcmp.eq.s32.totalorder %v31_v32, %v71_v49  ;;  %v181_v57 = vrot.slane %v179_v50, 4  ;;  %v184_v58 = vrot.slane %v182_v51, 5  ;;  %v1212_v49 = vld [vmem:[#allocation2 + $0x98] sm:$0xff]  }
  0x9f   :  { %1121 = vmatpush3.bf16.msra.mxu1 %v1198_v45  ;;  %vm90_vm1 = vmor %vm58_vm14, %vm86_vm12  ;;  %v199_v63 = vor.u32 %v198_v56, %v195_v55  ;;  %v531_v20 = vrot.slane %v179_v50, 5  ;;  %v532_v21 = vrot.slane %v182_v51, 6  ;;  %vm529_vm14 = vsmask.f32 6416  ;;  %v1211_v45 = vld [vmem:[#allocation2 + $0x90] sm:$0xff]   ;;  %v1213_v50 = vld [vmem:[#allocation2 + $0xa0] sm:$0xff]  }
  0xa0   :  { %1122 = vmatprep.subr.bf16.mxu1 %v1284_v1  ;;  %vm88_vm2 = vmor %vm56_vm15, %vm84_vm13  ;;  %v185_v2 = vor.u32 %v184_v58, %v181_v57  ;;  %vm528_vm13 = vsmask.f32 2304  ;;  %v543_v36 = vor.u32 %v542_v17, %v541_v16  ;;  %v1214_v51 = vld [vmem:[#allocation2 + $0xa8] sm:$0xff]   ;;  %v957_v55 = vrot.slane %v1354_v39, 9  ;;  %v1216_v57 = vld [vmem:[#allocation2 + $0xb8] sm:$0xff]  }
  0xa1   :  { %v114_v53 = vpop.permute.xlu1 %113  ;;  %v103_v54 = vpop.permute.xlu0 %102  ;;  %vm1386_vm12 = vmor %vm662_vm9, %vm663_vm10  ;;  %v200_v14 = vrot.slane %v199_v63, 4  ;;  %v533_v35 = vor.u32 %v532_v21, %v531_v20  ;;  %v956_v56 = vrot.slane %v1357_v43, 9  ;;  %v1219_v39 = vld [vmem:[#allocation2 + $0x110] sm:$0xff]   ;;  %v1220_v43 = vld [vmem:[#allocation2 + $0x118] sm:$0xff]  }
  0xa2   :  { %vm118_vm3 = vcmp.eq.s32.totalorder %v31_v32, %v114_v53  ;;  %vm116_vm4 = vcmp.eq.s32.totalorder %v31_v32, %v103_v54  ;;  %v186_v18 = vrot.slane %v185_v2, 4  ;;  %vm530_vm15 = vmor %vm528_vm13, %vm529_vm14  ;;  %v544_v44 = vrot.slane %v543_v36, 4  ;;  %v1221_v63 = vld [vmem:[#allocation2 + $0x120] sm:$0xff]   ;;  %v1223_v2 = vld [vmem:[#allocation2 + $0x130] sm:$0xff]  }
  0xa3   :  { %vm122_vm5 = vmor %vm90_vm1, %vm118_vm3  ;;  %1123 = vmatpush3.bf16.msra.mxu1 %v1200_v52  ;;  %v534_v42 = vrot.slane %v533_v35, 4  ;;  %v1215_v52 = vld [vmem:[#allocation2 + $0xb0] sm:$0xff]   ;;  %vm406_vm1 = vcmask 1042432  }
  0xa4   :  { %v933_v60 = vsel %vm122_vm5, 1.0, %v1284_v1  ;;  %vm120_vm6 = vmor %vm88_vm2, %vm116_vm4  ;;  %1124 = vmatprep.subr.bf16.mxu1 %v1284_v1  ;;  %vm407_vm2 = vcmask 1046532  }
  0xa5   :  { %v1369_v61 = vpack.c.bf16 %v933_v60, %v933_v60  ;;  %v931_v62 = vsel %vm120_vm6, 1.0, %v1284_v1  ;;  %vm408_vm3 = vmor %vm406_vm1, %vm407_vm2  ;;  %v1217_v60 = vld [vmem:[#allocation2 + $0x100] sm:$0xff]  }
  0xa6   :  { %v1372_v0 = vpack.c.bf16 %v931_v62, %v931_v62 }
  0xa7   :  { %v202_v4 = vshll.u32 %v1369_v61, 16  ;;  %1125 = vmatpush3.bf16.msra.mxu1 %v1202_v59  ;;  %v545_v7 = vshrl.u32 %v1369_v61, 16  ;;  %v671_v8 = vrot.slane %v1369_v61, 6  ;;  %v415_v53 = vrot.slane %v1369_v61, 5  ;;  %v1218_v61 = vld [vmem:[#allocation2 + $0x108] sm:$0xff]  }
  0xa8   :  { %v188_v9 = vshll.u32 %v1372_v0, 16  ;;  %v667_v10 = vrot.slane %v1372_v0, 6  ;;  %1126 = vmatprep.subr.bf16.mxu1 %v1284_v1  ;;  %v535_v13 = vshrl.u32 %v1372_v0, 16  ;;  %v411_v54 = vrot.slane %v1372_v0, 5  ;;  %v1222_v0 = vld [vmem:[#allocation2 + $0x128] sm:$0xff]  }
  0xa9   :  { %v204_v15 = vrot.slane %v202_v4, 5  ;;  %v547_v25 = vrot.slane %v545_v7, 5  ;;  %v548_v26 = vrot.slane %v202_v4, 6  ;;  %v1403_v29 = vsel %vm1386_vm12, %v977_v3, %v671_v8  ;;  %v1224_v3 = vld [vmem:[#allocation2 + $0x138] sm:$0xff]   ;;  %v1225_v4 = vld [vmem:[#allocation2 + $0x140] sm:$0xff]  }
  0xaa   :  { %v190_v19 = vrot.slane %v188_v9, 5  ;;  %v1396_v24 = vsel %vm1386_vm12, %v976_v12, %v667_v10  ;;  %v537_v30 = vrot.slane %v535_v13, 5  ;;  %v538_v31 = vrot.slane %v188_v9, 6  ;;  %v1228_v7 = vld [vmem:[#allocation2 + $0x158] sm:$0xff]   ;;  %v1229_v8 = vld [vmem:[#allocation2 + $0x160] sm:$0xff]   ;;  %v1230_v9 = vld [vmem:[#allocation2 + $0x168] sm:$0xff]  }
  0xab   :  { %1127 = vmatpush3.bf16.msra.mxu1 %v1204_v5  ;;  %v205_v23 = vsel %vm1376_vm11, %v200_v14, %v204_v15  ;;  %v978_v33 = vcombine.low %v1396_v24, %v1403_v29  ;;  %v549_v40 = vor.u32 %v548_v26, %v547_v25  ;;  %v412_v58 = vsel %vm408_vm3, %v956_v56, %v411_v54  ;;  %v1226_v5 = vld [vmem:[#allocation2 + $0x148] sm:$0xff]   ;;  %v1231_v10 = vld [vmem:[#allocation2 + $0x170] sm:$0xff]  }
  0xac   :  { %1128 = vmatprep.subr.bf16.mxu1 %v1284_v1  ;;  %v191_v27 = vsel %vm1376_vm11, %v186_v18, %v190_v19  ;;  %v539_v38 = vor.u32 %v538_v31, %v537_v30  ;;  %v416_v59 = vsel %vm408_vm3, %v957_v55, %v415_v53  ;;  %v987_v53 = vld [vmem:[%s1468_s2 + $0x8] ss:$0 sm:$0xff] }
  0xad   :  { %v938_v32 = vcombine.low %v191_v27, %v205_v23  ;;  %v550_v47 = vsel %vm530_vm15, %v544_v44, %v549_v40  ;;  %v958_v62 = vcombine.low %v412_v58, %v416_v59 }
  0xae   :  { %v540_v46 = vsel %vm530_vm15, %v534_v42, %v539_v38 }
  0xaf   :  { %1129 = vmatpush3.bf16.msra.mxu1 %v1206_v22  ;;  %1075 = vmatmul.mubr.bf16.vlgmr.msra.gmra.mrb[0].mxu0 %v938_v32  ;;  %v967_v48 = vcombine.low %v540_v46, %v550_v47 }
  0xb0   :  { %1099 = vmatpush3.bf16.msra.mxu0 %v1207_v28  ;;  %1130 = vmatprep.subr.bf16.mxu1 %v1284_v1 }
  0xb1   :  { %1100 = vmatprep.subr.bf16.mxu0 %v1284_v1  ;;  %1114 = vmatprep.mubr.msk.bf16.mxu0 %vm1285_vm0, %v1284_v1 }
  0xb3   :  { %1131 = vmatpush3.bf16.msra.mxu1 %v1208_v34  ;;  %v768_v34 = vld [vmem:[%s1468_s2] sm:$0xff] }
  0xb4   :  { %1101 = vmatpush3.bf16.msra.mxu0 %v1209_v37  ;;  %1132 = vmatprep.subr.bf16.mxu1 %v1284_v1 }
  0xb5   :  { %1102 = vmatprep.subr.bf16.mxu0 %v1284_v1 }
  0xb7   :  { %1133 = vmatpush3.bf16.msra.mxu1 %v1210_v41 }
  0xb8   :  { %1103 = vmatpush3.bf16.msra.mxu0 %v1211_v45  ;;  %1158 = vmatprep.subr.bf16.mxu1 %v1284_v1 }
  0xb9   :  { %1104 = vmatprep.subr.bf16.mxu0 %v1284_v1 }
  0xba   :  { %1135 = vmatmul.mubr.bf16.vlgmr.msra.gmra.mrb[4].mxu1 %v967_v48 }
  0xbb   :  { %1174 = vmatprep.mubr.msk.bf16.mxu1 %vm1285_vm0, %v1284_v1  ;;  %1159 = vmatpush3.bf16.msra.mxu1 %v1225_v4 }
  0xbc   :  { %1105 = vmatpush3.bf16.msra.mxu0 %v1212_v49  ;;  %1160 = vmatprep.subr.bf16.mxu1 %v1284_v1 }
  0xbd   :  { %1106 = vmatprep.subr.bf16.mxu0 %v1284_v1 }
  0xbf   :  { %1161 = vmatpush3.bf16.msra.mxu1 %v1226_v5 }
  0xc0   :  { %1107 = vmatpush3.bf16.msra.mxu0 %v1213_v50  ;;  %1162 = vmatprep.subr.bf16.mxu1 %v1284_v1 }
  0xc1   :  { %1108 = vmatprep.subr.bf16.mxu0 %v1284_v1 }
  0xc3   :  { %1163 = vmatpush3.bf16.msra.mxu1 %v1227_v6 }
  0xc4   :  { %1109 = vmatpush3.bf16.msra.mxu0 %v1214_v51  ;;  %1164 = vmatprep.subr.bf16.mxu1 %v1284_v1 }
  0xc5   :  { %1110 = vmatprep.subr.bf16.mxu0 %v1284_v1 }
  0xc7   :  { %1165 = vmatpush3.bf16.msra.mxu1 %v1228_v7 }
  0xc8   :  { %1111 = vmatpush3.bf16.msra.mxu0 %v1215_v52  ;;  %1166 = vmatprep.subr.bf16.mxu1 %v1284_v1 }
  0xc9   :  { %1112 = vmatprep.subr.bf16.mxu0 %v1284_v1 }
  0xcb   :  { %1167 = vmatpush3.bf16.msra.mxu1 %v1229_v8 }
  0xcc   :  { %1113 = vmatpush3.bf16.msra.mxu0 %v1216_v57  ;;  %1168 = vmatprep.subr.bf16.mxu1 %v1284_v1 }
  0xcd   :  { %1138 = vmatprep.subr.bf16.mxu0 %v1284_v1 }
  0xcf   :  { %1115 = vmatmul.mubr.bf16.vlgmr.msra.gmra.mrb[4].mxu0 %v958_v62  ;;  %1169 = vmatpush3.bf16.msra.mxu1 %v1230_v9 }
  0xd0   :  { %1139 = vmatpush3.bf16.msra.mxu0 %v1217_v60  ;;  %1154 = vmatprep.mubr.msk.bf16.mxu0 %vm1285_vm0, %v1284_v1  ;;  %vm820_vm0 = vcmask 1041409  }
  0xd1   :  { %1140 = vmatprep.subr.bf16.mxu0 %v1284_v1  ;;  %1170 = vmatprep.subr.bf16.mxu1 %v1284_v1 }
  0xd3   :  { %1171 = vmatpush3.bf16.msra.mxu1 %v1231_v10 }
  0xd4   :  { %1141 = vmatpush3.bf16.msra.mxu0 %v1218_v61  ;;  %1172 = vmatprep.subr.bf16.mxu1 %v1284_v1 }
  0xd5   :  { %1142 = vmatprep.subr.bf16.mxu0 %v1284_v1 }
  0xd7   :  { %1173 = vmatpush3.bf16.msra.mxu1 %v1232_v11 }
  0xd8   :  { %1143 = vmatpush3.bf16.msra.mxu0 %v1219_v39 }
  0xd9   :  { %1144 = vmatprep.subr.bf16.mxu0 %v1284_v1 }
  0xdc   :  { %1145 = vmatpush3.bf16.msra.mxu0 %v1220_v43 }
  0xdd   :  { %1146 = vmatprep.subr.bf16.mxu0 %v1284_v1 }
  0xe0   :  { %1147 = vmatpush3.bf16.msra.mxu0 %v1221_v63 }
  0xe1   :  { %1148 = vmatprep.subr.bf16.mxu0 %v1284_v1 }
  0xe4   :  { %1149 = vmatpush3.bf16.msra.mxu0 %v1222_v0 }
  0xe5   :  { %1150 = vmatprep.subr.bf16.mxu0 %v1284_v1 }
  0xe8   :  { %1151 = vmatpush3.bf16.msra.mxu0 %v1223_v2 }
  0xe9   :  { %1152 = vmatprep.subr.bf16.mxu0 %v1284_v1 }
  0xec   :  { %1153 = vmatpush3.bf16.msra.mxu0 %v1224_v3  ;;  %v988_v3 = vld [vmem:[%s1468_s2 + $0x9] ss:$0 sm:$0xff] }
  0xef   :  { %1155 = vmatmul.mubr.bf16.vlgmr.msra.gmra.mrb[8].mxu0 %v978_v33 }
 0x16d   :  { %v383_v12 = vpop.f32.mrb[0].mxu1 }
 0x16e   :  { %v1096_v13 = vpop.f32.mrb[1].mxu1 }
 0x16f   :  { %v386_v14 = vpop.f32.mrb[2].mxu1 }
 0x170   :  { %v1097_v15 = vpop.f32.mrb[3].mxu1 }
 0x182   :  { %v292_v16 = vpop.f32.mrb[0].mxu0 }
 0x183   :  { %v384_v17 = vadd.f32 %v383_v12, %v292_v16  ;;  %v1076_v18 = vpop.f32.mrb[1].mxu0 }
 0x184   :  { %v295_v19 = vpop.f32.mrb[2].mxu0 }
 0x185   :  { %v387_v20 = vadd.f32 %v386_v14, %v295_v19  ;;  %v1077_v21 = vpop.f32.mrb[3].mxu0 }
 0x18d   :  { %v637_v22 = vpop.f32.mrb[4].mxu1 }
 0x18e   :  { %v1136_v23 = vpop.f32.mrb[5].mxu1 }
 0x18f   :  { %v640_v24 = vpop.f32.mrb[6].mxu1 }
 0x190   :  { %v1137_v25 = vpop.f32.mrb[7].mxu1 }
 0x1a2   :  { %v503_v26 = vpop.f32.mrb[4].mxu0 }
 0x1a3   :  { %v510_v27 = vadd.f32 %v503_v26, %v384_v17  ;;  %v1116_v28 = vpop.f32.mrb[5].mxu0 }
 0x1a4   :  { %v506_v29 = vpop.f32.mrb[6].mxu0 }
 0x1a5   :  { %v511_v1 = vadd.f32 %v506_v29, %v387_v20  ;;  %v1117_v30 = vpop.f32.mrb[7].mxu0  ;;  %v644_v31 = vadd.f32 %v637_v22, %v510_v27 }
 0x1a7   :  { %v645_v32 = vadd.f32 %v640_v24, %v511_v1 }
 0x1c2   :  { %v759_v33 = vpop.f32.mrb[8].mxu0 }
 0x1c3   :  { %v766_v35 = vadd.f32 %v759_v33, %v644_v31  ;;  %v1156_v36 = vpop.f32.mrb[9].mxu0 }
 0x1c4   :  { %v762_v37 = vpop.f32.mrb[10].mxu0 }
 0x1c5   :  { %v769_v38 = vadd.f32 %v768_v34, %v766_v35  ;;  %v767_v40 = vadd.f32 %v762_v37, %v645_v32  ;;  %v1157_v41 = vpop.f32.mrb[11].mxu0 }
 0x1c7   :  { %v771_v42 = vrot.slane %v769_v38, 4  ;;  %v770_v44 = vadd.f32 %v768_v34, %v767_v40 }
 0x1c9   :  { %v772_v45 = vmax.f32 %v769_v38, %v771_v42  ;;  %v777_v46 = vrot.slane %v770_v44, 4 }
 0x1cb   :  { %v773_v47 = vrot.slane %v772_v45, 2  ;;  %v778_v48 = vmax.f32 %v770_v44, %v777_v46 }
 0x1cd   :  { %v774_v49 = vmax.f32 %v772_v45, %v773_v47  ;;  %v779_v50 = vrot.slane %v778_v48, 2 }
 0x1cf   :  { %v775_v51 = vrot.slane %v774_v49, 1  ;;  %v780_v52 = vmax.f32 %v778_v48, %v779_v50 }
 0x1d1   :  { %v776_v54 = vmax.f32 %v774_v49, %v775_v51  ;;  %v781_v55 = vrot.slane %v780_v52, 1 }
 0x1d3   :  { %v788_v56 = vadd.f32 %v987_v53, %v776_v54  ;;  %v782_v57 = vmax.f32 %v780_v52, %v781_v55 }
 0x1d5   :  { %v790_v58 = vmax.f32 %v788_v56, 0.0  ;;  %v789_v59 = vadd.f32 %v987_v53, %v782_v57 }
 0x1d7   :  { %v791_v60 = vmax.f32 %v789_v59, 0.0  ;;  %v808_v62 = vpack.c.bf16 %v790_v58, %v790_v58 }
 0x1d9   :  { %v809_v61 = vpack.c.bf16 %v791_v60, %v791_v60  ;;  %v817_v43 = vunpack.c.l.b16 %v808_v62 }
 0x1db   :  { %v818_v39 = vunpack.c.l.b16 %v809_v61 }
 0x1dd   :  { %v819_v63 = vrot.slane %v818_v39, 7 }
 0x1df   :  { %v821_v0 = vsel %vm820_vm0, %v819_v63, %v817_v43 }
 0x1e0   :  { %v822_v2 = vpack.c.b16 %v821_v0, %v821_v0 }
 0x1e2   :  { %1175 = vmatmul.mubr.bf16.vlgmr.msra.gmra.mrb[8].mxu1 %v822_v2 }
 0x2b5   :  { %v906_v4 = vpop.f32.mrb[8].mxu1 }
 0x2b6   :  { %v907_v5 = vadd.f32 %v988_v3, %v906_v4  ;;  %v1176_v6 = vpop.f32.mrb[9].mxu1 }
 0x2b7   :  { %v909_v7 = vpop.f32.mrb[10].mxu1 }
 0x2b8   :  { %912 = vst [vmem:[#allocation5] sm:$0x3] %v907_v5  ;;  %v1177_v8 = vpop.f32.mrb[11].mxu1 }
 0x2b9   :  { %1266 = shalt.err (!%p1263_p12)
}
 0x2ba   :  { %s1267_s2 = scalar_lea.hbm %s1469_s3, 32 }
 0x2bb   :  { %p1268_p13 = scmp.ne.s32.totalorder %s1469_s3, %s1267_s2  ;;  %p1271_p0 = scmp.lt.u32.totalorder %s1267_s2, %s1469_s3 }
 0x2bd   :  { %p1273_p1 = pnand %p1271_p0, %p1268_p13 }
 0x2bf   :  { %1276 = shalt.err (!%p1273_p1)
}
 0x2c0   :  { %922 = dma.vmem_to_hbm [thread:$0]  %s920_s10, 32, %s1469_s3, [#allocation4]  }
 0x2c1   :  { %1279 = dma.done.wait [#allocation4], 32  }
 0x2c2   :  { %1280 = vsyncadd [#allocation4], 4294967264 }
 0x2c3   :  { %926 = vsyncpa [#allocation3], 1 }
 0x2c4   :  { %927 = vsyncpa [#allocation4], 1 }

</bundles_post_ra>
